<compile_context>
chip_gen: v7x
topology: tpu7x:2x2x1
jax: 0.10.0
libtpu: 0.0.40
codegen_flags: <defaults>
</compile_context>

<pallas_src>
import functools

import numpy as np

import jax
import jax.numpy as jnp
from jax.experimental import pallas as pl
from jax.experimental.pallas import tpu as pltpu


# ------------------------------- fused kernel --------------------------------
def _fused_concat_kernel(x_ref, w_ref, b_ref, s_ref, o_ref, xstack_ref, *,
                         W, HW, Nb, Cin):
    # x_ref     : (Cin, Nb*HW)   channels-first input, Nb images on the lane axis
    # w_ref     : (Cout, 9*Cin)  fused weight, tap-major column blocks
    # b_ref     : (Cout, 1)      fused bias
    # s_ref     : (HW, HmWm)     shared 0/1 crop-selection matrix
    # o_ref     : (Nb, Cout, HmWm)
    # xstack_ref: (9*Cin, Nb*HW) VMEM scratch (im2col operand)
    x = x_ref[...]
    L = x.shape[1]                                      # Nb * HW (static)

    # im2col along sublanes: x and its 8 lane-rolled copies.  roll by L - s
    # places x[:, p + s] at lane p; wrapped lanes (p + s >= HW within an image)
    # are never read by the selection matrix (asserted on the host).
    xstack_ref[0:Cin, :] = x
    for tap in range(1, 9):
        dh, dw = divmod(tap, 3)
        s = dh * W + dw
        xstack_ref[tap * Cin:(tap + 1) * Cin, :] = pltpu.roll(
            x, shift=L - s, axis=1)

    # Single fused matmul: both branches, all 9 taps.
    y = jnp.dot(w_ref[...], xstack_ref[...],
                preferred_element_type=jnp.float32) + b_ref[...]   # (Cout, L)

    # Shared center-crop (0/1 selection matmul) + one full-slab store per image.
    for j in range(Nb):
        o_ref[j] = jnp.dot(y[:, j * HW:(j + 1) * HW], s_ref[...],
                           preferred_element_type=jnp.float32)


# ------------------------------- host-side prep -------------------------------
def _prepare_constants(params, h, w):
    """numpy prep (outside jit): fused weight/bias and shared crop selection."""
    w0 = np.asarray(params["w0"], np.float32)          # (Cin, C0)
    b0 = np.asarray(params["b0"], np.float32)          # (C0,)
    w1 = np.asarray(params["w1"], np.float32)          # (3, 3, Cin, C1) HWIO
    b1 = np.asarray(params["b1"], np.float32)          # (C1,)
    cin, c0 = w0.shape
    c1 = w1.shape[3]

    hm, wm = h - 2, w - 2                               # min spatial (3x3 VALID)
    hw, hmwm = h * w, hm * wm
    # Branch-0 (full HxW) center-crop offset must be (1,1) for the tap-fold trick.
    assert (h - hm) // 2 == 1 and (w - wm) // 2 == 1

    # Fused weight: tap-major column blocks.  Branch-1 rows carry all 9 taps;
    # branch-0 rows only the (dh,dw)=(1,1) tap, which also applies its crop
    # shift so one selection matrix serves both branches.
    wbig = np.zeros((c0 + c1, 9 * cin), np.float32)
    for tap in range(9):
        dh, dw = divmod(tap, 3)
        wbig[c0:, tap * cin:(tap + 1) * cin] = w1[dh, dw].T        # (C1, Cin)
    center_tap = 1 * 3 + 1
    wbig[:c0, center_tap * cin:(center_tap + 1) * cin] = w0.T      # (C0, Cin)
    bbig = np.concatenate([b0, b1]).reshape(-1, 1).astype(np.float32)

    # Shared 0/1 crop-selection matrix (branch-1 frame, offset 0): column p_out
    # has a single 1 at flat source index (p_out//Wm)*W + (p_out%Wm).
    p_out = np.arange(hmwm)
    src = (p_out // wm) * w + (p_out % wm)
    sel = (np.arange(hw)[:, None] == src[None, :]).astype(np.float32)

    # Roll-wraparound safety: every selected lane plus the largest tap shift
    # must stay inside the same image's HW lanes.
    assert int(src.max()) + (2 * w + 2) < hw, \
        "pltpu.roll wrap-around would alias a lane read by the crop selection"

    return jnp.asarray(wbig), jnp.asarray(bbig), jnp.asarray(sel)


@jax.jit
def _concat_pallas(x_nchw, wbig, bbig, sel):
    n, cin, h, w = x_nchw.shape
    cout = wbig.shape[0]
    hw, hmwm = h * w, sel.shape[1]
    hm, wm = h - 2, w - 2

    # Batch blocking: 2 equal grid steps when possible (feeds both v7x TCs via
    # the "parallel" axis), otherwise a single step; Nb images per step
    # amortize the ~0.35us per-step overhead and give lane-dense DMAs.
    steps = 2 if (n % 2 == 0 and n >= 2) else 1
    nb = n // steps

    # Channels-first with batch folded into the lane axis: (Cin, N*HW).
    x_k = x_nchw.reshape(n, cin, hw).transpose(1, 0, 2).reshape(cin, n * hw)

    kern = functools.partial(_fused_concat_kernel, W=w, HW=hw, Nb=nb, Cin=cin)
    out = pl.pallas_call(
        kern,
        out_shape=jax.ShapeDtypeStruct((n, cout, hmwm), jnp.float32),
        grid=(steps,),
        in_specs=[
            pl.BlockSpec((cin, nb * hw), lambda i: (0, i)),
            pl.BlockSpec((cout, 9 * cin), lambda i: (0, 0)),
            pl.BlockSpec((cout, 1), lambda i: (0, 0)),
            pl.BlockSpec((hw, hmwm), lambda i: (0, 0)),
        ],
        out_specs=pl.BlockSpec((nb, cout, hmwm), lambda i: (i, 0, 0)),
        scratch_shapes=[pltpu.VMEM((9 * cin, nb * hw), jnp.float32)],
        compiler_params=pltpu.CompilerParams(
            dimension_semantics=("parallel",)),
    )(x_k, wbig, bbig, sel)

    return out.reshape(n, cout, hm, wm)                   # free reshape


def concat_module_forward(x_nchw, params):
    """Equivalent of Concat(dim=1, conv1x1_branch, conv3x3_branch)(x_nchw)."""
    _, _, h, w = x_nchw.shape
    wbig, bbig, sel = _prepare_constants(params, h, w)    # numpy, outside jit
    return _concat_pallas(x_nchw, wbig, bbig, sel)


# --------------------------------- reference -----------------------------------
def reference_forward(x_nchw, params):
    r0 = jnp.einsum("nchw,cd->ndhw", x_nchw, params["w0"],
                    precision=jax.lax.Precision.HIGHEST)
    r0 = r0 + params["b0"][None, :, None, None]
    r1 = jax.lax.conv_general_dilated(
        x_nchw, params["w1"], window_strides=(1, 1), padding="VALID",
        dimension_numbers=("NCHW", "HWIO", "NCHW"),
        precision=jax.lax.Precision.HIGHEST)
    r1 = r1 + params["b1"][None, :, None, None]
    hm = min(r0.shape[2], r1.shape[2])
    wm = min(r0.shape[3], r1.shape[3])

    def crop(t):
        dh = (t.shape[2] - hm) // 2
        dw = (t.shape[3] - wm) // 2
        return t[:, :, dh:dh + hm, dw:dw + wm]

    return jnp.concatenate([crop(r0), crop(r1)], axis=1)


if __name__ == "__main__":
    N, CIN, H, W = 2, 4, 16, 16
    C0, C1 = 4, 6

    key = jax.random.PRNGKey(0)
    kx, kw0, kb0, kw1, kb1 = jax.random.split(key, 5)

    x = jax.random.normal(kx, (N, CIN, H, W), dtype=jnp.float32)   # NCHW input
    params = {
        "w0": 0.1 * jax.random.normal(kw0, (CIN, C0), dtype=jnp.float32),
        "b0": 0.05 * jax.random.normal(kb0, (C0,), dtype=jnp.float32),
        "w1": 0.1 * jax.random.normal(kw1, (3, 3, CIN, C1), dtype=jnp.float32),
        "b1": 0.05 * jax.random.normal(kb1, (C1,), dtype=jnp.float32),
    }

    out = jax.block_until_ready(concat_module_forward(x, params))
    ref = jax.block_until_ready(reference_forward(x, params))

    assert out.shape == (N, C0 + C1, 14, 14), out.shape
    assert jnp.allclose(out, ref, atol=1e-5, rtol=1e-5), float(
        jnp.max(jnp.abs(out - ref)))
    print("KERNEL_OK")
</pallas_src>

<mosaic_0001>
module attributes {stable_mosaic.version = 11 : i64} {
  func.func @_fused_concat_kernel(%arg0: i32, %arg1: memref<4x256xf32, #tpu.memory_space<vmem>>, %arg2: memref<10x36xf32, #tpu.memory_space<vmem>>, %arg3: memref<10x1xf32, #tpu.memory_space<vmem>>, %arg4: memref<256x196xf32, #tpu.memory_space<vmem>>, %arg5: memref<1x10x196xf32, #tpu.memory_space<vmem>>, %arg6: memref<36x256xf32, #tpu.memory_space<vmem>>) attributes {dimension_semantics = [#tpu.dimension_semantics<parallel>], iteration_bounds = array<i64: 2>, scalar_prefetch = 0 : i64, scratch_operands = 1 : i64, tpu.core_type = #tpu.core_type<tc>, window_params = [{transform_indices = @transform_0, window_bounds = array<i64: 4, 256>}, {pipeline_mode = #tpu.pipeline_mode<synchronous>, transform_indices = @transform_1, window_bounds = array<i64: 10, 36>}, {pipeline_mode = #tpu.pipeline_mode<synchronous>, transform_indices = @transform_2, window_bounds = array<i64: 10, 1>}, {pipeline_mode = #tpu.pipeline_mode<synchronous>, transform_indices = @transform_3, window_bounds = array<i64: 256, 196>}, {transform_indices = @transform_4, window_bounds = array<i64: 1, 10, 196>}]} {
    %c0 = arith.constant 0 : index
    %c0_0 = arith.constant 0 : index
    %0 = vector.load %arg1[%c0, %c0_0] : memref<4x256xf32, #tpu.memory_space<vmem>>, vector<4x256xf32>
    %c0_1 = arith.constant 0 : index
    %c0_2 = arith.constant 0 : index
    %1 = vector.load %arg6[%c0_1, %c0_2] : memref<36x256xf32, #tpu.memory_space<vmem>>, vector<4x256xf32>
    tpu.vector_store %arg6[%c0_1, %c0_2], %0 {strides = array<i32>} : memref<36x256xf32, #tpu.memory_space<vmem>>, vector<4x256xf32>,
    %c255_i32 = arith.constant 255 : i32
    %2 = tpu.dynamic_rotate %0 by %c255_i32 dim 1 : vector<4x256xf32>, i32 -> vector<4x256xf32>
    %c4 = arith.constant 4 : index
    %c0_3 = arith.constant 0 : index
    %3 = vector.load %arg6[%c4, %c0_3] : memref<36x256xf32, #tpu.memory_space<vmem>>, vector<4x256xf32>
    tpu.vector_store %arg6[%c4, %c0_3], %2 {strides = array<i32>} : memref<36x256xf32, #tpu.memory_space<vmem>>, vector<4x256xf32>,
    %c254_i32 = arith.constant 254 : i32
    %4 = tpu.dynamic_rotate %0 by %c254_i32 dim 1 : vector<4x256xf32>, i32 -> vector<4x256xf32>
    %c8 = arith.constant 8 : index
    %c0_4 = arith.constant 0 : index
    %5 = vector.load %arg6[%c8, %c0_4] : memref<36x256xf32, #tpu.memory_space<vmem>>, vector<4x256xf32>
    tpu.vector_store %arg6[%c8, %c0_4], %4 {strides = array<i32>} : memref<36x256xf32, #tpu.memory_space<vmem>>, vector<4x256xf32>,
    %c240_i32 = arith.constant 240 : i32
    %6 = tpu.dynamic_rotate %0 by %c240_i32 dim 1 : vector<4x256xf32>, i32 -> vector<4x256xf32>
    %c12 = arith.constant 12 : index
    %c0_5 = arith.constant 0 : index
    %7 = vector.load %arg6[%c12, %c0_5] : memref<36x256xf32, #tpu.memory_space<vmem>>, vector<4x256xf32>
    tpu.vector_store %arg6[%c12, %c0_5], %6 {strides = array<i32>} : memref<36x256xf32, #tpu.memory_space<vmem>>, vector<4x256xf32>,
    %c239_i32 = arith.constant 239 : i32
    %8 = tpu.dynamic_rotate %0 by %c239_i32 dim 1 : vector<4x256xf32>, i32 -> vector<4x256xf32>
    %c16 = arith.constant 16 : index
    %c0_6 = arith.constant 0 : index
    %9 = vector.load %arg6[%c16, %c0_6] : memref<36x256xf32, #tpu.memory_space<vmem>>, vector<4x256xf32>
    tpu.vector_store %arg6[%c16, %c0_6], %8 {strides = array<i32>} : memref<36x256xf32, #tpu.memory_space<vmem>>, vector<4x256xf32>,
    %c238_i32 = arith.constant 238 : i32
    %10 = tpu.dynamic_rotate %0 by %c238_i32 dim 1 : vector<4x256xf32>, i32 -> vector<4x256xf32>
    %c20 = arith.constant 20 : index
    %c0_7 = arith.constant 0 : index
    %11 = vector.load %arg6[%c20, %c0_7] : memref<36x256xf32, #tpu.memory_space<vmem>>, vector<4x256xf32>
    tpu.vector_store %arg6[%c20, %c0_7], %10 {strides = array<i32>} : memref<36x256xf32, #tpu.memory_space<vmem>>, vector<4x256xf32>,
    %c224_i32 = arith.constant 224 : i32
    %12 = tpu.dynamic_rotate %0 by %c224_i32 dim 1 : vector<4x256xf32>, i32 -> vector<4x256xf32>
    %c24 = arith.constant 24 : index
    %c0_8 = arith.constant 0 : index
    %13 = vector.load %arg6[%c24, %c0_8] : memref<36x256xf32, #tpu.memory_space<vmem>>, vector<4x256xf32>
    tpu.vector_store %arg6[%c24, %c0_8], %12 {strides = array<i32>} : memref<36x256xf32, #tpu.memory_space<vmem>>, vector<4x256xf32>,
    %c223_i32 = arith.constant 223 : i32
    %14 = tpu.dynamic_rotate %0 by %c223_i32 dim 1 : vector<4x256xf32>, i32 -> vector<4x256xf32>
    %c28 = arith.constant 28 : index
    %c0_9 = arith.constant 0 : index
    %15 = vector.load %arg6[%c28, %c0_9] : memref<36x256xf32, #tpu.memory_space<vmem>>, vector<4x256xf32>
    tpu.vector_store %arg6[%c28, %c0_9], %14 {strides = array<i32>} : memref<36x256xf32, #tpu.memory_space<vmem>>, vector<4x256xf32>,
    %c222_i32 = arith.constant 222 : i32
    %16 = tpu.dynamic_rotate %0 by %c222_i32 dim 1 : vector<4x256xf32>, i32 -> vector<4x256xf32>
    %c32 = arith.constant 32 : index
    %c0_10 = arith.constant 0 : index
    %17 = vector.load %arg6[%c32, %c0_10] : memref<36x256xf32, #tpu.memory_space<vmem>>, vector<4x256xf32>
    tpu.vector_store %arg6[%c32, %c0_10], %16 {strides = array<i32>} : memref<36x256xf32, #tpu.memory_space<vmem>>, vector<4x256xf32>,
    %c0_11 = arith.constant 0 : index
    %c0_12 = arith.constant 0 : index
    %18 = vector.load %arg2[%c0_11, %c0_12] : memref<10x36xf32, #tpu.memory_space<vmem>>, vector<10x36xf32>
    %c0_13 = arith.constant 0 : index
    %c0_14 = arith.constant 0 : index
    %19 = vector.load %arg6[%c0_13, %c0_14] : memref<36x256xf32, #tpu.memory_space<vmem>>, vector<36x256xf32>
    %cst = arith.constant dense<0.000000e+00> : vector<10x256xf32>
    %20 = tpu.matmul %18, %19, %cst {dimension_numbers = #tpu.dot_dimension_numbers<[1], [0], [0], [1], [0, 0, 1, 1], [], []>} : vector<10x36xf32>, vector<36x256xf32>, vector<10x256xf32> -> vector<10x256xf32>
    %c0_15 = arith.constant 0 : index
    %c0_16 = arith.constant 0 : index
    %21 = vector.load %arg3[%c0_15, %c0_16] : memref<10x1xf32, #tpu.memory_space<vmem>>, vector<10x1xf32>
    %22 = vector.broadcast %21 : vector<10x1xf32> to vector<10x256xf32>
    %23 = arith.addf %20, %22 : vector<10x256xf32>
    %c0_17 = arith.constant 0 : index
    %c0_18 = arith.constant 0 : index
    %24 = vector.load %arg4[%c0_17, %c0_18] : memref<256x196xf32, #tpu.memory_space<vmem>>, vector<256x196xf32>
    %cst_19 = arith.constant dense<0.000000e+00> : vector<10x196xf32>
    %25 = tpu.matmul %23, %24, %cst_19 {dimension_numbers = #tpu.dot_dimension_numbers<[1], [0], [0], [1], [0, 0, 1, 1], [], []>} : vector<10x256xf32>, vector<256x196xf32>, vector<10x196xf32> -> vector<10x196xf32>
    %c0_20 = arith.constant 0 : index
    %c0_21 = arith.constant 0 : index
    %c0_22 = arith.constant 0 : index
    %26 = vector.load %arg5[%c0_20, %c0_21, %c0_22] : memref<1x10x196xf32, #tpu.memory_space<vmem>>, vector<1x10x196xf32>
    %27 = vector.shape_cast %26 : vector<1x10x196xf32> to vector<10x196xf32>
    %28 = vector.shape_cast %25 : vector<10x196xf32> to vector<1x10x196xf32>
    tpu.vector_store %arg5[%c0_20, %c0_21, %c0_22], %28 {strides = array<i32>} : memref<1x10x196xf32, #tpu.memory_space<vmem>>, vector<1x10x196xf32>,
    return
  }
  func.func @transform_0(%arg0: i32) -> (i32, i32) {
    %c0_i32 = arith.constant 0 : i32
    %c0_i32_0 = arith.constant 0 : i32
    return %c0_i32, %arg0 : i32, i32
  }
  func.func @transform_1(%arg0: i32) -> (i32, i32) {
    %c0_i32 = arith.constant 0 : i32
    %c0_i32_0 = arith.constant 0 : i32
    %c0_i32_1 = arith.constant 0 : i32
    return %c0_i32, %c0_i32_0 : i32, i32
  }
  func.func @transform_2(%arg0: i32) -> (i32, i32) {
    %c0_i32 = arith.constant 0 : i32
    %c0_i32_0 = arith.constant 0 : i32
    %c0_i32_1 = arith.constant 0 : i32
    return %c0_i32, %c0_i32_0 : i32, i32
  }
  func.func @transform_3(%arg0: i32) -> (i32, i32) {
    %c0_i32 = arith.constant 0 : i32
    %c0_i32_0 = arith.constant 0 : i32
    %c0_i32_1 = arith.constant 0 : i32
    return %c0_i32, %c0_i32_0 : i32, i32
  }
  func.func @transform_4(%arg0: i32) -> (i32, i32, i32) {
    %c0_i32 = arith.constant 0 : i32
    %c0_i32_0 = arith.constant 0 : i32
    %c0_i32_1 = arith.constant 0 : i32
    return %arg0, %c0_i32, %c0_i32_0 : i32, i32, i32
  }
}

</mosaic_0001>

<bundles_post_ra>
// kernel: _concat_pallas.1
= control target key start
LH: loop header
LB: loop body
LE: loop exit
PB: predicated region body
PF: predicated region fallthrough
CT: control target
= control target key end

     0   :  { %s773_s15 = smov 0   ;;  %s1011_s0 = inlined_call_operand.vmem [shape: f32[4,512], index: 0, kind: input, shape index: {}]   ;;  %s1012_s1 = inlined_call_operand.vmem [shape: f32[10,36], index: 1, kind: input, shape index: {}]   ;;  %s1013_s2 = inlined_call_operand.vmem [shape: f32[10,1], index: 2, kind: input, shape index: {}]   ;;  %s1014_s3 = inlined_call_operand.vmem [shape: f32[256,196], index: 3, kind: input, shape index: {}]   ;;  %s1015_s4 = inlined_call_operand.vmem [shape: f32[2,10,196], index: 4, kind: output, shape index: {}]  }
   0x1 LB: > { %s779_s16 = sadd.s32 4294967295, %s736_s15   ;;  %p625_p0 = scmp.ge.s32.totalorder %s736_s15, 1  ;;  %s736_s15 = sphi %s773_s15, %s14_s15  }
   0x2   : > { %p163_p1 = scmp.lt.s32.totalorder %s736_s15, 3 }
   0x4   : > { %p164_p2 = pnand %p625_p0, %p163_p1 }
   0x5   : > { %s626_s17 = sshll.u32 (!%p164_p2), %s779_s16, 1  ;;  %s738_s22 = smov (!%p164_p2), 112   ;;  %v745_v2 = vmov (!%p164_p2), 0.0   ;;  %v316_v3 = vld [vmem:[%s1013_s2] sm:$0xff] (!%p164_p2)  ;;  %v317_v4 = vld [vmem:[%s1013_s2 + $0x8] sm:$0x3] (!%p164_p2) }
   0x6   : > { %167 = sbr.rel (%p164_p2) target bundleno = 607 (0x25f), region = 36  ;;  %p190_p3 = scmp.lt.s32.totalorder (!%p164_p2), %s626_s17, 3  ;;  %406 = vmatprep.mubr.f32.mxu0 (!%p164_p2), %v745_v2  ;;  %v420_v5 = vld [vmem:[%s1014_s3 + $0x8] sm:$0xff] (!%p164_p2)  ;;  %v747_v6 = vmov (!%p164_p2), 0   ;;  %v422_v7 = vld [vmem:[%s1014_s3 + $0x18] sm:$0xff] (!%p164_p2)  ;;  %v419_v8 = vld [vmem:[%s1014_s3] sm:$0xff] (!%p164_p2) }
   0x7   : > { %s739_s23 = smov (!%p164_p2), 127   ;;  %s740_s24 = smov (!%p164_p2), 126   ;;  %727 = vset.pattern.permute.xlu0 (!%p164_p2), %v747_v6  ;;  %728 = vset.pattern.permute.xlu1 (!%p164_p2), %v747_v6  ;;  %v421_v9 = vld [vmem:[%s1014_s3 + $0x10] sm:$0xff] (!%p164_p2)  ;;  %v645_v10 = vpack.c.bf16 (!%p164_p2), %v422_v7, %v420_v5  ;;  %v424_v12 = vld [vmem:[%s1014_s3 + $0x28] sm:$0xff] (!%p164_p2)  ;;  %v426_v13 = vld [vmem:[%s1014_s3 + $0x38] sm:$0xff] (!%p164_p2)  ;;  %vm335_vm8 = vcmask (!%p164_p2), 1043456  }
   0x8   : > { %s741_s25 = smov (!%p164_p2), 110   ;;  %s742_s26 = smov (!%p164_p2), 95   ;;  %v647_v11 = vpack.c.bf16 (!%p164_p2), %v421_v9, %v419_v8  ;;  %v423_v14 = vld [vmem:[%s1014_s3 + $0x20] sm:$0xff] (!%p164_p2)  ;;  %v649_v15 = vpack.c.bf16 (!%p164_p2), %v426_v13, %v424_v12  ;;  %v425_v16 = vld [vmem:[%s1014_s3 + $0x30] sm:$0xff] (!%p164_p2)  ;;  %v428_v17 = vld [vmem:[%s1014_s3 + $0x48] sm:$0xff] (!%p164_p2)  ;;  %vm328_vm9 = vcmask (!%p164_p2), 293888  }
   0x9   : > { %s743_s27 = smov (!%p164_p2), 111   ;;  %s744_s28 = smov (!%p164_p2), 96   ;;  %v430_v18 = vld [vmem:[%s1014_s3 + $0x58] sm:$0xff] (!%p164_p2)  ;;  %646 = vmatprep.subr.bf16.mxu1 (!%p164_p2), %v645_v10  ;;  %v651_v19 = vpack.c.bf16 (!%p164_p2), %v425_v16, %v423_v14  ;;  %v427_v21 = vld [vmem:[%s1014_s3 + $0x40] sm:$0xff] (!%p164_p2)  ;;  %v429_v22 = vld [vmem:[%s1014_s3 + $0x50] sm:$0xff] (!%p164_p2)  ;;  %vm561_vm10 = vcmask (!%p164_p2), 556032  }
   0xa   : > { %s746_s29 = smov (!%p164_p2), 94   ;;  %648 = vmatpush1.bf16.msra.mxu1 (!%p164_p2), %v647_v11  ;;  %v653_v20 = vpack.c.bf16 (!%p164_p2), %v430_v18, %v428_v17  ;;  %v432_v23 = vld [vmem:[%s1014_s3 + $0x68] sm:$0xff] (!%p164_p2)  ;;  %v434_v24 = vld [vmem:[%s1014_s3 + $0x78] sm:$0xff] (!%p164_p2)  ;;  %v655_v25 = vpack.c.bf16 (!%p164_p2), %v429_v22, %v427_v21  ;;  %v431_v27 = vld [vmem:[%s1014_s3 + $0x60] sm:$0xff] (!%p164_p2)  ;;  %p195_p4 = scmp.lt.s32.totalorder (!%p164_p2), %s779_s16, 1  ;;  %vm564_vm11 = vcmask (!%p164_p2), 549888  }
   0xb   : > { %650 = vmatprep.subr.bf16.mxu1 (!%p164_p2), %v649_v15  ;;  %v657_v26 = vpack.c.bf16 (!%p164_p2), %v434_v24, %v432_v23  ;;  %v433_v28 = vld [vmem:[%s1014_s3 + $0x70] sm:$0xff] (!%p164_p2)  ;;  %v436_v29 = vld [vmem:[%s1014_s3 + $0x88] sm:$0xff] (!%p164_p2)  ;;  %v438_v30 = vld [vmem:[%s1014_s3 + $0x98] sm:$0xff] (!%p164_p2) }
   0xc   : > { %v659_v31 = vpack.c.bf16 (!%p164_p2), %v433_v28, %v431_v27  ;;  %v661_v32 = vpack.c.bf16 (!%p164_p2), %v438_v30, %v436_v29  ;;  %v435_v33 = vld [vmem:[%s1014_s3 + $0x80] sm:$0xff] (!%p164_p2)  ;;  %v437_v34 = vld [vmem:[%s1014_s3 + $0x90] sm:$0xff] (!%p164_p2)  ;;  %v440_v35 = vld [vmem:[%s1014_s3 + $0xa8] sm:$0xff] (!%p164_p2) }
   0xd   : > { %s1017_s17 = smov (!%p190_p3, %s626_s17), 3  ;;  %v442_v36 = vld [vmem:[%s1014_s3 + $0xb8] sm:$0xff]  ;;  %v663_v37 = vpack.c.bf16 %v437_v34, %v435_v33  ;;  %v439_v39 = vld [vmem:[%s1014_s3 + $0xa0] sm:$0xff]  ;;  %v441_v40 = vld [vmem:[%s1014_s3 + $0xb0] sm:$0xff]  ;;  %v210_v33 = vlaneseq  ;;  %s1019_s16 = smov (!%p195_p4, %s779_s16), 1 }
   0xe   : > { %s627_s18 = sshll.u32 %s1017_s17, 2  ;;  %652 = vmatpush1.bf16.msra.mxu1 %v651_v19  ;;  %v665_v38 = vpack.c.bf16 %v442_v36, %v440_v35  ;;  %v444_v41 = vld [vmem:[%s1014_s3 + $0xc8] sm:$0xff]  ;;  %v446_v42 = vld [vmem:[%s1014_s3 + $0xd8] sm:$0xff]  ;;  %v667_v43 = vpack.c.bf16 %v441_v40, %v439_v39  ;;  %v443_v45 = vld [vmem:[%s1014_s3 + $0xc0] sm:$0xff] }
   0xf   : > { %s193_s21 = scalar_lea.vmem %s1011_s0, %s627_s18  ;;  %654 = vmatprep.subr.bf16.mxu1 %v653_v20  ;;  %v669_v44 = vpack.c.bf16 %v446_v42, %v444_v41  ;;  %v445_v46 = vld [vmem:[%s1014_s3 + $0xd0] sm:$0xff]  ;;  %v448_v47 = vld [vmem:[%s1014_s3 + $0xe8] sm:$0xff]  ;;  %v450_v48 = vld [vmem:[%s1014_s3 + $0xf8] sm:$0xff]  ;;  %v974_v34 = vand.u32 127, %v210_v33 }
  0x10   : > { %v200_v0 = vld [vmem:[%s193_s21] sm:$0xff]  ;;  %v671_v49 = vpack.c.bf16 %v445_v46, %v443_v45  ;;  %v673_v50 = vpack.c.bf16 %v450_v48, %v448_v47  ;;  %v449_v52 = vld [vmem:[%s1014_s3 + $0xf0] sm:$0xff]  ;;  %v452_v53 = vld [vmem:[%s1014_s3 + $0x108] sm:$0xff] }
  0x11   : > { %232 = vrot.lane.b32.xlu1 %v200_v0, %s738_s22  ;;  %204 = vst [vmem:[#allocation2] sm:$0xf] %v200_v0  ;;  %206 = vrot.lane.b32.xlu0 %v200_v0, %s739_s23  ;;  %v202_v1 = vcombine.high %v200_v0, %v200_v0  ;;  %v447_v51 = vld [vmem:[%s1014_s3 + $0xe0] sm:$0xff]  ;;  %v454_v54 = vld [vmem:[%s1014_s3 + $0x118] sm:$0xff]  ;;  %vm236_vm0 = vcmp.lt.s32.totalorder %v974_v34, 112  ;;  %vm227_vm1 = vcmp.lt.s32.totalorder %v974_v34, 126 }
  0x12   : > { %656 = vmatpush1.bf16.msra.mxu1 %v655_v25  ;;  %v675_v55 = vpack.c.bf16 %v449_v52, %v447_v51  ;;  %v677_v56 = vpack.c.bf16 %v454_v54, %v452_v53  ;;  %v451_v57 = vld [vmem:[%s1014_s3 + $0x100] sm:$0xff]  ;;  %v453_v58 = vld [vmem:[%s1014_s3 + $0x110] sm:$0xff]  ;;  %v456_v59 = vld [vmem:[%s1014_s3 + $0x128] sm:$0xff]  ;;  %vm212_vm2 = vcmp.lt.s32.totalorder %v974_v34, 127  ;;  %vm260_vm3 = vcmp.lt.s32.totalorder %v974_v34, 110 }
  0x13   : > { %205 = vst [vmem:[#allocation2 + $0x8] sm:$0xf] %v202_v1  ;;  %658 = vmatprep.subr.bf16.mxu1 %v657_v26  ;;  %v458_v60 = vld [vmem:[%s1014_s3 + $0x138] sm:$0xff]  ;;  %v679_v61 = vpack.c.bf16 %v453_v58, %v451_v57  ;;  %v455_v63 = vld [vmem:[%s1014_s3 + $0x120] sm:$0xff]  ;;  %v461_v7 = vld [vmem:[%s1014_s3 + $0x150] sm:$0xff]  ;;  %vm284_vm4 = vcmp.lt.s32.totalorder %v974_v34, 95 }
  0x14   : > { %v681_v62 = vpack.c.bf16 %v458_v60, %v456_v59  ;;  %v459_v6 = vld [vmem:[%s1014_s3 + $0x140] sm:$0xff]  ;;  %v464_v8 = vld [vmem:[%s1014_s3 + $0x168] sm:$0xff]  ;;  %v466_v9 = vld [vmem:[%s1014_s3 + $0x178] sm:$0xff]  ;;  %vm251_vm5 = vcmp.lt.s32.totalorder %v974_v34, 111  ;;  %vm275_vm6 = vcmp.lt.s32.totalorder %v974_v34, 96  ;;  %vm299_vm7 = vcmp.lt.s32.totalorder %v974_v34, 94 }
  0x15   : > { %223 = vrot.lane.b32.xlu0 %v200_v0, %s740_s24  ;;  %234 = vrot.lane.b32.xlu1 %v202_v1, %s738_s22  ;;  %v687_v10 = vpack.c.bf16 %v461_v7, %v459_v6  ;;  %v689_v11 = vpack.c.bf16 %v466_v9, %v464_v8  ;;  %v463_v12 = vld [vmem:[%s1014_s3 + $0x160] sm:$0xff]  ;;  %v465_v13 = vld [vmem:[%s1014_s3 + $0x170] sm:$0xff]  ;;  %s636_s22 = sshll.u32 %s1019_s16, 5 }
  0x16   : > { %660 = vmatpush1.bf16.msra.mxu1 %v659_v31  ;;  %v468_v14 = vld [vmem:[%s1014_s3 + $0x188] sm:$0xff]  ;;  %v470_v15 = vld [vmem:[%s1014_s3 + $0x198] sm:$0xff]  ;;  %v691_v16 = vpack.c.bf16 %v465_v13, %v463_v12  ;;  %v467_v18 = vld [vmem:[%s1014_s3 + $0x180] sm:$0xff] }
  0x17   : > { %662 = vmatprep.subr.bf16.mxu1 %v661_v32  ;;  %v693_v17 = vpack.c.bf16 %v470_v15, %v468_v14  ;;  %v469_v19 = vld [vmem:[%s1014_s3 + $0x190] sm:$0xff]  ;;  %v472_v20 = vld [vmem:[%s1014_s3 + $0x1a8] sm:$0xff]  ;;  %v474_v21 = vld [vmem:[%s1014_s3 + $0x1b8] sm:$0xff] }
  0x18   : > { %v695_v22 = vpack.c.bf16 %v469_v19, %v467_v18  ;;  %v697_v23 = vpack.c.bf16 %v474_v21, %v472_v20  ;;  %v471_v24 = vld [vmem:[%s1014_s3 + $0x1a0] sm:$0xff]  ;;  %v473_v25 = vld [vmem:[%s1014_s3 + $0x1b0] sm:$0xff]  ;;  %v476_v26 = vld [vmem:[%s1014_s3 + $0x1c8] sm:$0xff] }
  0x19   : > { %225 = vrot.lane.b32.xlu1 %v202_v1, %s740_s24  ;;  %208 = vrot.lane.b32.xlu0 %v202_v1, %s739_s23  ;;  %v478_v27 = vld [vmem:[%s1014_s3 + $0x1d8] sm:$0xff]  ;;  %v699_v28 = vpack.c.bf16 %v473_v25, %v471_v24  ;;  %v475_v30 = vld [vmem:[%s1014_s3 + $0x1c0] sm:$0xff] }
  0x1a   : > { %664 = vmatpush1.bf16.msra.mxu1 %v663_v37  ;;  %v701_v29 = vpack.c.bf16 %v478_v27, %v476_v26  ;;  %v477_v31 = vld [vmem:[%s1014_s3 + $0x1d0] sm:$0xff]  ;;  %v304_v26 = vld [vmem:[%s1012_s1] sm:$0xff]  ;;  %v305_v27 = vld [vmem:[%s1012_s1 + $0x8] sm:$0x3] }
  0x1b   : > { %666 = vmatprep.subr.bf16.mxu1 %v665_v38  ;;  %v703_v32 = vpack.c.bf16 %v477_v31, %v475_v30  ;;  %v479_v31 = vld [vmem:[%s1014_s3 + $0x1e0] sm:$0xff] }
  0x1d   : > { %258 = vrot.lane.b32.xlu1 %v202_v1, %s741_s25  ;;  %256 = vrot.lane.b32.xlu0 %v200_v0, %s741_s25  ;;  %s199_s25 = scalar_lea.vmem %s1015_s4, %s636_s22 }
  0x1e   : > { %668 = vmatpush1.bf16.msra.mxu1 %v667_v43 }
  0x1f   : > { %670 = vmatprep.subr.bf16.mxu1 %v669_v44 }
  0x21   : > { %282 = vrot.lane.b32.xlu1 %v202_v1, %s742_s26  ;;  %280 = vrot.lane.b32.xlu0 %v200_v0, %s742_s26 }
  0x22   : > { %672 = vmatpush1.bf16.msra.mxu1 %v671_v49 }
  0x23   : > { %674 = vmatprep.subr.bf16.mxu1 %v673_v50 }
  0x25   : > { %249 = vrot.lane.b32.xlu1 %v202_v1, %s743_s27  ;;  %247 = vrot.lane.b32.xlu0 %v200_v0, %s743_s27 }
  0x26   : > { %676 = vmatpush1.bf16.msra.mxu1 %v675_v55 }
  0x27   : > { %678 = vmatprep.subr.bf16.mxu1 %v677_v56 }
  0x29   : > { %273 = vrot.lane.b32.xlu1 %v202_v1, %s744_s28  ;;  %271 = vrot.lane.b32.xlu0 %v200_v0, %s744_s28 }
  0x2a   : > { %680 = vmatpush1.bf16.msra.mxu1 %v679_v61 }
  0x2b   : > { %682 = vmatprep.subr.bf16.mxu1 %v681_v62 }
  0x2d   : > { %297 = vrot.lane.b32.xlu1 %v202_v1, %s746_s29  ;;  %295 = vrot.lane.b32.xlu0 %v200_v0, %s746_s29  ;;  %v457_v0 = vld [vmem:[%s1014_s3 + $0x130] sm:$0xff]  ;;  %v460_v1 = vld [vmem:[%s1014_s3 + $0x148] sm:$0xff] }
  0x31   : > { %320 = vperm.xlu0 %727, %v316_v3   ;;  %325 = vperm.xlu1 %728, %v317_v4   ;;  %v462_v3 = vld [vmem:[%s1014_s3 + $0x158] sm:$0xff]  ;;  %v683_v4 = vpack.c.bf16 %v457_v0, %v455_v63 }
  0x32   : > { %v685_v5 = vpack.c.bf16 %v462_v3, %v460_v1 }
  0x33   : > { %684 = vmatpush1.bf16.msra.mxu1 %v683_v4 }
  0x34   : > { %686 = vmatprep.subr.bf16.mxu1 %v685_v5 }
  0x37   : > { %688 = vmatpush1.bf16.msra.mxu1 %v687_v10 }
  0x38   : > { %690 = vmatprep.subr.bf16.mxu1 %v689_v11 }
  0x3b   : > { %692 = vmatpush1.bf16.msra.mxu1 %v691_v16 }
  0x3c   : > { %694 = vmatprep.subr.bf16.mxu1 %v693_v17 }
  0x3f   : > { %696 = vmatpush1.bf16.msra.mxu1 %v695_v22 }
  0x40   : > { %698 = vmatprep.subr.bf16.mxu1 %v697_v23 }
  0x43   : > { %700 = vmatpush1.bf16.msra.mxu1 %v699_v28  ;;  %v480_v28 = vld [vmem:[%s1014_s3 + $0x1e8] sm:$0xff] }
  0x44   : > { %702 = vmatprep.subr.bf16.mxu1 %v701_v29  ;;  %v482_v29 = vld [vmem:[%s1014_s3 + $0x1f8] sm:$0xff] }
  0x45   : > { %v705_v30 = vpack.c.bf16 %v482_v29, %v480_v28 }
  0x47   : > { %704 = vmatpush1.bf16.msra.mxu1 %v703_v32 }
  0x48   : > { %706 = vmatprep.subr.bf16.mxu1 %v705_v30 }
  0x83   : > { %v233_v35 = vpop.permute.xlu1 %232  ;;  %v207_v36 = vpop.permute.xlu0 %206 }
  0x87   : > { %v224_v37 = vpop.permute.xlu0 %223  ;;  %v235_v38 = vpop.permute.xlu1 %234 }
  0x88   : > { %v237_v39 = vsel %vm236_vm0, %v233_v35, %v235_v38  ;;  %v238_v40 = vsel %vm236_vm0, %v235_v38, %v233_v35 }
  0x89   : > { %v241_v41 = vrot.slane %v237_v39, 4  ;;  %v242_v42 = vrot.slane %v238_v40, 4 }
  0x8b   : > { %245 = vst [vmem:[#allocation2 + $0x10] sm:$0xf0] %v241_v41  ;;  %246 = vst [vmem:[#allocation2 + $0x18] sm:$0xf0] %v242_v42  ;;  %v226_v43 = vpop.permute.xlu1 %225  ;;  %v209_v44 = vpop.permute.xlu0 %208 }
  0x8c   : > { %v228_v45 = vsel %vm227_vm1, %v224_v37, %v226_v43  ;;  %v229_v46 = vsel %vm227_vm1, %v226_v43, %v224_v37  ;;  %v213_v47 = vsel %vm212_vm2, %v207_v36, %v209_v44  ;;  %v214_v48 = vsel %vm212_vm2, %v209_v44, %v207_v36 }
  0x8d   : > { %230 = vst [vmem:[#allocation2 + $0x10] sm:$0xf] %v228_v45  ;;  %231 = vst [vmem:[#allocation2 + $0x18] sm:$0xf] %v229_v46  ;;  %v217_v49 = vrot.slane %v213_v47, 4  ;;  %v218_v50 = vrot.slane %v214_v48, 4 }
  0x8f   : > { %221 = vst [vmem:[#allocation2] sm:$0xf0] %v217_v49  ;;  %222 = vst [vmem:[#allocation2 + $0x8] sm:$0xf0] %v218_v50  ;;  %v259_v51 = vpop.permute.xlu1 %258  ;;  %v257_v52 = vpop.permute.xlu0 %256 }
  0x90   : > { %v261_v53 = vsel %vm260_vm3, %v257_v52, %v259_v51  ;;  %v262_v54 = vsel %vm260_vm3, %v259_v51, %v257_v52 }
  0x91   : > { %v265_v55 = vrot.slane %v261_v53, 4  ;;  %v266_v56 = vrot.slane %v262_v54, 4 }
  0x93   : > { %269 = vst [vmem:[#allocation2 + $0x20] sm:$0xf0] %v265_v55  ;;  %270 = vst [vmem:[#allocation2 + $0x28] sm:$0xf0] %v266_v56  ;;  %v283_v57 = vpop.permute.xlu1 %282  ;;  %v281_v58 = vpop.permute.xlu0 %280 }
  0x94   : > { %v285_v59 = vsel %vm284_vm4, %v281_v58, %v283_v57  ;;  %v286_v60 = vsel %vm284_vm4, %v283_v57, %v281_v58  ;;  %v309_v63 = vld [vmem:[#allocation2 + $0x18] sm:$0xff]  ;;  %v308_v3 = vld [vmem:[#allocation2 + $0x10] sm:$0xff] }
  0x95   : > { %v289_v61 = vrot.slane %v285_v59, 4  ;;  %v290_v62 = vrot.slane %v286_v60, 4 }
  0x96   : > { %v307_v0 = vld [vmem:[#allocation2 + $0x8] sm:$0xff]  ;;  %v306_v1 = vld [vmem:[#allocation2] sm:$0xff] }
  0x97   : > { %293 = vst [vmem:[#allocation2 + $0x30] sm:$0xf0] %v289_v61  ;;  %294 = vst [vmem:[#allocation2 + $0x38] sm:$0xf0] %v290_v62  ;;  %v250_v4 = vpop.permute.xlu1 %249  ;;  %v248_v5 = vpop.permute.xlu0 %247  ;;  %v637_v6 = vpack.c.bf16 %v309_v63, %v307_v0  ;;  %v639_v7 = vpack.c.bf16 %v308_v3, %v306_v1 }
  0x98   : > { %v252_v8 = vsel %vm251_vm5, %v248_v5, %v250_v4  ;;  %v253_v9 = vsel %vm251_vm5, %v250_v4, %v248_v5 }
  0x99   : > { %254 = vst [vmem:[#allocation2 + $0x20] sm:$0xf] %v252_v8  ;;  %255 = vst [vmem:[#allocation2 + $0x28] sm:$0xf] %v253_v9  ;;  %638 = vmatprep.subr.bf16.mxu0 %v637_v6 }
  0x9a   : > { %640 = vmatpush1.bf16.msra.mxu0 %v639_v7 }
  0x9b   : > { %v274_v10 = vpop.permute.xlu1 %273  ;;  %v272_v11 = vpop.permute.xlu0 %271 }
  0x9c   : > { %v276_v12 = vsel %vm275_vm6, %v272_v11, %v274_v10  ;;  %v277_v13 = vsel %vm275_vm6, %v274_v10, %v272_v11 }
  0x9d   : > { %278 = vst [vmem:[#allocation2 + $0x30] sm:$0xf] %v276_v12  ;;  %279 = vst [vmem:[#allocation2 + $0x38] sm:$0xf] %v277_v13 }
  0x9f   : > { %v298_v14 = vpop.permute.xlu1 %297  ;;  %v296_v15 = vpop.permute.xlu0 %295 }
  0xa0   : > { %v300_v16 = vsel %vm299_vm7, %v296_v15, %v298_v14  ;;  %v301_v17 = vsel %vm299_vm7, %v298_v14, %v296_v15  ;;  %v311_v18 = vld [vmem:[#allocation2 + $0x28] sm:$0xff]  ;;  %v310_v20 = vld [vmem:[#allocation2 + $0x20] sm:$0xff] }
  0xa1   : > { %302 = vst [vmem:[#allocation2 + $0x40] sm:$0xf] %v300_v16  ;;  %303 = vst [vmem:[#allocation2 + $0x48] sm:$0xf] %v301_v17 }
  0xa4   : > { %v313_v19 = vld [vmem:[#allocation2 + $0x38] sm:$0xff]  ;;  %v312_v21 = vld [vmem:[#allocation2 + $0x30] sm:$0xff] }
  0xa5   : > { %v641_v22 = vpack.c.bf16 %v313_v19, %v311_v18  ;;  %v643_v23 = vpack.c.bf16 %v312_v21, %v310_v20 }
  0xa7   : > { %642 = vmatprep.subr.bf16.mxu0 %v641_v22 }
  0xa8   : > { %644 = vmatpush1.bf16.msra.mxu0 %v643_v23  ;;  %v315_v24 = vld [vmem:[#allocation2 + $0x48] sm:$0xf]  ;;  %v314_v25 = vld [vmem:[#allocation2 + $0x40] sm:$0xf] }
  0xa9   : > { %630 = vmatprep.subr.msk.mxu0 %vm335_vm8, %v315_v24 }
  0xac   : > { %631 = vmatpush1.msk.msra.mxu0 %vm335_vm8, %v314_v25 }
  0xad   : > { %632 = vmatmul.mubr.msk.f32.vlgmr.msra.gmra.mrb[0].mxu0 %vm328_vm9, %v304_v26 }
  0xae   : > { %412 = vmatprep.mubr.f32.mxu0 %v745_v2  ;;  %v481_v2 = vld [vmem:[%s1014_s3 + $0x1f0] sm:$0xff] }
  0xaf   : > { %v707_v32 = vpack.c.bf16 %v481_v2, %v479_v31 }
  0xb0   : > { %v321_v33 = vpop.permute.xlu0 %320  ;;  %v326_v38 = vpop.permute.xlu1 %325 }
  0xb1   : > { %633 = vmatmul.mubr.msk.f32.gmra.mrb[2].mxu0 %vm328_vm9, %v305_v27  ;;  %708 = vmatpush1.bf16.msra.mxu1 %v707_v32 }
 0x180   : > { %v408_v34 = vpop.f32.mrb[0].mxu0 }
 0x181   : > { %v410_v35 = vpop.f32.mrb[1].mxu0  ;;  %v409_v37 = vadd.f32 %v408_v34, %v321_v33 }
 0x182   : > { %v411_v36 = vadd.f32 %v410_v35, %v321_v33 }
 0x184   : > { %v414_v39 = vpop.f32.mrb[2].mxu0  ;;  %547 = vmatprep.mubr.f32.mxu1 %v411_v36 }
 0x185   : > { %v416_v40 = vpop.f32.mrb[3].mxu0  ;;  %548 = vmatmul.mubr.f32.vlgmr.msra.gmra.mrb[0].mxu1 %v409_v37  ;;  %v415_v42 = vadd.f32 %v414_v39, %v326_v38 }
 0x186   : > { %v417_v41 = vadd.f32 %v416_v40, %v326_v38 }
 0x188   : > { %553 = vmatprep.mubr.f32.mxu1 %v417_v41 }
 0x189   : > { %554 = vmatmul.mubr.f32.gmra.mrb[2].mxu1 %v415_v42 }
 0x258   : > { %v549_v43 = vpop.f32.mrb[0].mxu1 }
 0x259   : > { %560 = vst [vmem:[%s199_s25] sm:$0xff] %v549_v43  ;;  %v551_v44 = vpop.f32.mrb[1].mxu1 }
 0x25a   : > { %562 = vst.msk [vmem:[%s199_s25 + $0x8] sm:$0xff] %vm561_vm10, %v551_v44 }
 0x25c   : > { %v555_v45 = vpop.f32.mrb[2].mxu1 }
 0x25d   : > { %563 = vst [vmem:[%s199_s25 + $0x10] sm:$0x3] %v555_v45  ;;  %v557_v46 = vpop.f32.mrb[3].mxu1 }
 0x25e   : > { %565 = vst.msk [vmem:[%s199_s25 + $0x18] sm:$0x3] %vm564_vm11, %v557_v46 }
 0x25f PF: > { %s14_s15 = sadd.s32 1, %s736_s15  }
 0x260   : > { %p11_p5 = scmp.ge.s32.totalorder %s14_s15, 4  }
 0x262   :  { %13 = sbr.rel (!%p11_p5) target bundleno = 1 (0x1), region = 66 }

</bundles_post_ra>
